<compile_context>
chip_gen: v7x
topology: tpu7x:2x2x1
jax: 0.10.0
libtpu: 0.0.40
codegen_flags: <defaults>
</compile_context>

<pallas_src>
import jax
import jax.numpy as jnp
from jax import lax
from jax.experimental import pallas as pl
from jax.experimental.pallas import tpu as pltpu

IN_F = 30
H = 16
OUT_F = 1
DROP_P = 0.2
KEEP_P = 1.0 - DROP_P
INV_KEEP = 1.0 / KEEP_P
KEEP_THRESH_24 = int(KEEP_P * (1 << 24))  # keep iff low-24 hash bits < thresh

MAX_TILE = 8192  # batch rows per grid step (multiple of 8 and 256)

# murmur3-style 32-bit mixing constants, pre-wrapped to signed int32.
_M1 = -2048144789      # 0x85EBCA6B
_M2 = -1028477387      # 0xC2B2AE35
_GOLD = -1640531535    # 0x9E3779B1


def _srl(h, n):
    """Logical right shift on int32 (explicit, works on Mosaic and interpret)."""
    return lax.shift_right_logical(h, jnp.full_like(h, n))


def _fmix32(h):
    h = h ^ _srl(h, 16)
    h = h * jnp.int32(_M1)
    h = h ^ _srl(h, 13)
    h = h * jnp.int32(_M2)
    h = h ^ _srl(h, 16)
    return h


def _keep_mask(seed, rows, layer):
    """Deterministic Bernoulli(KEEP_P) keep mask of shape (rows, H).

    Uses the global row index (pl.program_id(0) * rows + local row) so every
    batch tile -- and every TensorCore under megacore sharding -- draws
    independent dropout masks for a given seed.
    """
    r = lax.broadcasted_iota(jnp.int32, (rows, H), 0)
    c = lax.broadcasted_iota(jnp.int32, (rows, H), 1)
    row_g = pl.program_id(0) * rows + r
    # Unique element id per (row, col, layer); wraps for B > ~67M rows, which
    # only mildly degrades mask uniqueness (acceptable for dropout).
    idx = row_g * jnp.int32(2 * H) + c + jnp.int32(layer * H)
    h = _fmix32(idx ^ (seed * jnp.int32(_GOLD)))
    return (h & jnp.int32(0x00FFFFFF)) < jnp.int32(KEEP_THRESH_24)


def mlp_kernel(seed_ref, x_ref, w1_ref, b1_ref, w2_ref, b2_ref, w3_ref, b3_ref,
               o_ref):
    seed = seed_ref[0]
    rows = x_ref.shape[0]

    x = x_ref[...]  # [TB, 30]

    # fc1 + relu + dropout(0.2)  (inverted dropout, training semantics)
    h1 = jnp.dot(x, w1_ref[...], preferred_element_type=jnp.float32) + b1_ref[...]
    h1 = jnp.maximum(h1, 0.0)
    h1 = jnp.where(_keep_mask(seed, rows, 0), h1 * jnp.float32(INV_KEEP), 0.0)

    # fc2 + relu + dropout(0.2)
    h2 = jnp.dot(h1, w2_ref[...], preferred_element_type=jnp.float32) + b2_ref[...]
    h2 = jnp.maximum(h2, 0.0)
    h2 = jnp.where(_keep_mask(seed, rows, 1), h2 * jnp.float32(INV_KEEP), 0.0)

    # fc3 + sigmoid
    z = jnp.dot(h2, w3_ref[...], preferred_element_type=jnp.float32) + b3_ref[...]
    o_ref[...] = 1.0 / (1.0 + jnp.exp(-z))


def mlp_forward(x, params, seed=0):
    """x: [B, 30] float32; params: dict w1,b1,w2,b2,w3,b3; seed: int."""
    B = x.shape[0]
    # Single full block for small B (full-dim blocks are always legal);
    # otherwise tile the batch with TB=8192 (multiple of 8/256) and let the
    # last block be partial.
    TB = B if B <= MAX_TILE else MAX_TILE
    grid = (pl.cdiv(B, TB),)

    seed_arr = jnp.asarray([seed], dtype=jnp.int32)

    smem = pl.BlockSpec(memory_space=pltpu.MemorySpace.SMEM)

    def resident(shape):
        # Constant index_map -> block never changes -> weights stay in VMEM.
        return pl.BlockSpec(shape, lambda i: (0, 0))

    return pl.pallas_call(
        mlp_kernel,
        out_shape=jax.ShapeDtypeStruct((B, OUT_F), jnp.float32),
        grid=grid,
        in_specs=[
            smem,                                            # seed (scalar)
            pl.BlockSpec((TB, IN_F), lambda i: (i, 0)),      # x, batch-tiled
            resident((IN_F, H)), resident((1, H)),           # fc1
            resident((H, H)),    resident((1, H)),           # fc2
            resident((H, OUT_F)), resident((1, OUT_F)),      # fc3
        ],
        out_specs=pl.BlockSpec((TB, OUT_F), lambda i: (i, 0)),
        compiler_params=pltpu.CompilerParams(
            dimension_semantics=("parallel",),      # megacore sharding on v7x
            vmem_limit_bytes=48 * 1024 * 1024,      # headroom under v7x 64 MiB
        ),
    )(seed_arr, x,
      params["w1"], params["b1"],
      params["w2"], params["b2"],
      params["w3"], params["b3"])


def init_params(key):
    """PyTorch-like init: U(-1/sqrt(fan_in), 1/sqrt(fan_in)), weights [in, out]."""
    ks = jax.random.split(key, 6)

    def lin(kw, kb, fan_in, fan_out):
        bound = 1.0 / (fan_in ** 0.5)
        w = jax.random.uniform(kw, (fan_in, fan_out), jnp.float32, -bound, bound)
        b = jax.random.uniform(kb, (1, fan_out), jnp.float32, -bound, bound)
        return w, b

    w1, b1 = lin(ks[0], ks[1], IN_F, H)
    w2, b2 = lin(ks[2], ks[3], H, H)
    w3, b3 = lin(ks[4], ks[5], H, OUT_F)
    return {"w1": w1, "b1": b1, "w2": w2, "b2": b2, "w3": w3, "b3": b3}


if __name__ == "__main__":
    key = jax.random.PRNGKey(0)
    k_params, k_x = jax.random.split(key)

    B = 8
    x = jax.random.normal(k_x, (B, IN_F), dtype=jnp.float32)
    params = init_params(k_params)

    out = jax.block_until_ready(mlp_forward(x, params, seed=0))

    assert out.shape == (B, OUT_F)
    assert bool(jnp.all((out >= 0.0) & (out <= 1.0)))
    assert bool(jnp.all(jnp.isfinite(out)))
    print("KERNEL_OK")
</pallas_src>

<mosaic_0001>
module attributes {stable_mosaic.version = 11 : i64} {
  func.func @mlp_kernel(%arg0: i32, %arg1: memref<1xi32, #tpu.memory_space<smem>>, %arg2: memref<8x30xf32, #tpu.memory_space<vmem>>, %arg3: memref<30x16xf32, #tpu.memory_space<vmem>>, %arg4: memref<1x16xf32, #tpu.memory_space<vmem>>, %arg5: memref<16x16xf32, #tpu.memory_space<vmem>>, %arg6: memref<1x16xf32, #tpu.memory_space<vmem>>, %arg7: memref<16x1xf32, #tpu.memory_space<vmem>>, %arg8: memref<1x1xf32, #tpu.memory_space<vmem>>, %arg9: memref<8x1xf32, #tpu.memory_space<vmem>>) attributes {dimension_semantics = [#tpu.dimension_semantics<parallel>], iteration_bounds = array<i64: 1>, scalar_prefetch = 0 : i64, scratch_operands = 0 : i64, tpu.core_type = #tpu.core_type<tc>, window_params = [{transform_indices = @transform_0, window_bounds = array<i64: 1>}, {transform_indices = @transform_1, window_bounds = array<i64: 8, 30>}, {pipeline_mode = #tpu.pipeline_mode<synchronous>, transform_indices = @transform_2, window_bounds = array<i64: 30, 16>}, {pipeline_mode = #tpu.pipeline_mode<synchronous>, transform_indices = @transform_3, window_bounds = array<i64: 1, 16>}, {pipeline_mode = #tpu.pipeline_mode<synchronous>, transform_indices = @transform_4, window_bounds = array<i64: 16, 16>}, {pipeline_mode = #tpu.pipeline_mode<synchronous>, transform_indices = @transform_5, window_bounds = array<i64: 1, 16>}, {pipeline_mode = #tpu.pipeline_mode<synchronous>, transform_indices = @transform_6, window_bounds = array<i64: 16, 1>}, {pipeline_mode = #tpu.pipeline_mode<synchronous>, transform_indices = @transform_7, window_bounds = array<i64: 1, 1>}, {transform_indices = @transform_8, window_bounds = array<i64: 8, 1>}]} {
    %c0 = arith.constant 0 : index
    %0 = memref.load %arg1[%c0] : memref<1xi32, #tpu.memory_space<smem>>
    %c0_0 = arith.constant 0 : index
    %c0_1 = arith.constant 0 : index
    %1 = vector.load %arg2[%c0_0, %c0_1] : memref<8x30xf32, #tpu.memory_space<vmem>>, vector<8x30xf32>
    %c0_2 = arith.constant 0 : index
    %c0_3 = arith.constant 0 : index
    %2 = vector.load %arg3[%c0_2, %c0_3] : memref<30x16xf32, #tpu.memory_space<vmem>>, vector<30x16xf32>
    %cst = arith.constant dense<0.000000e+00> : vector<8x16xf32>
    %3 = tpu.matmul %1, %2, %cst {dimension_numbers = #tpu.dot_dimension_numbers<[1], [0], [0], [1], [0, 0, 1, 1], [], []>} : vector<8x30xf32>, vector<30x16xf32>, vector<8x16xf32> -> vector<8x16xf32>
    %c0_4 = arith.constant 0 : index
    %c0_5 = arith.constant 0 : index
    %4 = vector.load %arg4[%c0_4, %c0_5] : memref<1x16xf32, #tpu.memory_space<vmem>>, vector<1x16xf32>
    %5 = vector.broadcast %4 : vector<1x16xf32> to vector<8x16xf32>
    %6 = arith.addf %3, %5 : vector<8x16xf32>
    %cst_6 = arith.constant 0.000000e+00 : f32
    %7 = vector.broadcast %cst_6 : f32 to vector<8x16xf32>
    %8 = arith.maximumf %6, %7 : vector<8x16xf32>
    %9 = tpu.iota {dimensions = array<i32: 0>} : vector<8x16xi32>
    %10 = tpu.iota {dimensions = array<i32: 1>} : vector<8x16xi32>
    %c8_i32 = arith.constant 8 : i32
    %11 = arith.muli %arg0, %c8_i32 : i32
    %12 = vector.broadcast %11 : i32 to vector<8x16xi32>
    %13 = arith.addi %12, %9 : vector<8x16xi32>
    %c32_i32 = arith.constant 32 : i32
    %14 = vector.broadcast %c32_i32 : i32 to vector<8x16xi32>
    %15 = arith.muli %13, %14 : vector<8x16xi32>
    %16 = arith.addi %15, %10 : vector<8x16xi32>
    %c0_i32 = arith.constant 0 : i32
    %17 = vector.broadcast %c0_i32 : i32 to vector<8x16xi32>
    %18 = arith.addi %16, %17 : vector<8x16xi32>
    %c-1640531535_i32 = arith.constant -1640531535 : i32
    %19 = arith.muli %0, %c-1640531535_i32 : i32
    %20 = vector.broadcast %19 : i32 to vector<8x16xi32>
    %21 = arith.xori %18, %20 : vector<8x16xi32>
    %c16_i32 = arith.constant 16 : i32
    %22 = vector.broadcast %c16_i32 : i32 to vector<8x16xi32>
    %23 = arith.shrui %21, %22 : vector<8x16xi32>
    %24 = arith.xori %21, %23 : vector<8x16xi32>
    %c-2048144789_i32 = arith.constant -2048144789 : i32
    %25 = vector.broadcast %c-2048144789_i32 : i32 to vector<8x16xi32>
    %26 = arith.muli %24, %25 : vector<8x16xi32>
    %c13_i32 = arith.constant 13 : i32
    %27 = vector.broadcast %c13_i32 : i32 to vector<8x16xi32>
    %28 = arith.shrui %26, %27 : vector<8x16xi32>
    %29 = arith.xori %26, %28 : vector<8x16xi32>
    %c-1028477387_i32 = arith.constant -1028477387 : i32
    %30 = vector.broadcast %c-1028477387_i32 : i32 to vector<8x16xi32>
    %31 = arith.muli %29, %30 : vector<8x16xi32>
    %c16_i32_7 = arith.constant 16 : i32
    %32 = vector.broadcast %c16_i32_7 : i32 to vector<8x16xi32>
    %33 = arith.shrui %31, %32 : vector<8x16xi32>
    %34 = arith.xori %31, %33 : vector<8x16xi32>
    %c16777215_i32 = arith.constant 16777215 : i32
    %35 = vector.broadcast %c16777215_i32 : i32 to vector<8x16xi32>
    %36 = arith.andi %34, %35 : vector<8x16xi32>
    %c13421772_i32 = arith.constant 13421772 : i32
    %37 = vector.broadcast %c13421772_i32 : i32 to vector<8x16xi32>
    %38 = arith.cmpi slt, %36, %37 : vector<8x16xi32>
    %cst_8 = arith.constant 1.250000e+00 : f32
    %39 = vector.broadcast %cst_8 : f32 to vector<8x16xf32>
    %40 = arith.mulf %8, %39 : vector<8x16xf32>
    %cst_9 = arith.constant 0.000000e+00 : f32
    %41 = vector.broadcast %cst_9 : f32 to vector<8x16xf32>
    %42 = arith.select %38, %40, %41 : vector<8x16xi1>, vector<8x16xf32>
    %c0_10 = arith.constant 0 : index
    %c0_11 = arith.constant 0 : index
    %43 = vector.load %arg5[%c0_10, %c0_11] : memref<16x16xf32, #tpu.memory_space<vmem>>, vector<16x16xf32>
    %cst_12 = arith.constant dense<0.000000e+00> : vector<8x16xf32>
    %44 = tpu.matmul %42, %43, %cst_12 {dimension_numbers = #tpu.dot_dimension_numbers<[1], [0], [0], [1], [0, 0, 1, 1], [], []>} : vector<8x16xf32>, vector<16x16xf32>, vector<8x16xf32> -> vector<8x16xf32>
    %c0_13 = arith.constant 0 : index
    %c0_14 = arith.constant 0 : index
    %45 = vector.load %arg6[%c0_13, %c0_14] : memref<1x16xf32, #tpu.memory_space<vmem>>, vector<1x16xf32>
    %46 = vector.broadcast %45 : vector<1x16xf32> to vector<8x16xf32>
    %47 = arith.addf %44, %46 : vector<8x16xf32>
    %cst_15 = arith.constant 0.000000e+00 : f32
    %48 = vector.broadcast %cst_15 : f32 to vector<8x16xf32>
    %49 = arith.maximumf %47, %48 : vector<8x16xf32>
    %50 = tpu.iota {dimensions = array<i32: 0>} : vector<8x16xi32>
    %51 = tpu.iota {dimensions = array<i32: 1>} : vector<8x16xi32>
    %c8_i32_16 = arith.constant 8 : i32
    %52 = arith.muli %arg0, %c8_i32_16 : i32
    %53 = vector.broadcast %52 : i32 to vector<8x16xi32>
    %54 = arith.addi %53, %50 : vector<8x16xi32>
    %c32_i32_17 = arith.constant 32 : i32
    %55 = vector.broadcast %c32_i32_17 : i32 to vector<8x16xi32>
    %56 = arith.muli %54, %55 : vector<8x16xi32>
    %57 = arith.addi %56, %51 : vector<8x16xi32>
    %c16_i32_18 = arith.constant 16 : i32
    %58 = vector.broadcast %c16_i32_18 : i32 to vector<8x16xi32>
    %59 = arith.addi %57, %58 : vector<8x16xi32>
    %c-1640531535_i32_19 = arith.constant -1640531535 : i32
    %60 = arith.muli %0, %c-1640531535_i32_19 : i32
    %61 = vector.broadcast %60 : i32 to vector<8x16xi32>
    %62 = arith.xori %59, %61 : vector<8x16xi32>
    %c16_i32_20 = arith.constant 16 : i32
    %63 = vector.broadcast %c16_i32_20 : i32 to vector<8x16xi32>
    %64 = arith.shrui %62, %63 : vector<8x16xi32>
    %65 = arith.xori %62, %64 : vector<8x16xi32>
    %c-2048144789_i32_21 = arith.constant -2048144789 : i32
    %66 = vector.broadcast %c-2048144789_i32_21 : i32 to vector<8x16xi32>
    %67 = arith.muli %65, %66 : vector<8x16xi32>
    %c13_i32_22 = arith.constant 13 : i32
    %68 = vector.broadcast %c13_i32_22 : i32 to vector<8x16xi32>
    %69 = arith.shrui %67, %68 : vector<8x16xi32>
    %70 = arith.xori %67, %69 : vector<8x16xi32>
    %c-1028477387_i32_23 = arith.constant -1028477387 : i32
    %71 = vector.broadcast %c-1028477387_i32_23 : i32 to vector<8x16xi32>
    %72 = arith.muli %70, %71 : vector<8x16xi32>
    %c16_i32_24 = arith.constant 16 : i32
    %73 = vector.broadcast %c16_i32_24 : i32 to vector<8x16xi32>
    %74 = arith.shrui %72, %73 : vector<8x16xi32>
    %75 = arith.xori %72, %74 : vector<8x16xi32>
    %c16777215_i32_25 = arith.constant 16777215 : i32
    %76 = vector.broadcast %c16777215_i32_25 : i32 to vector<8x16xi32>
    %77 = arith.andi %75, %76 : vector<8x16xi32>
    %c13421772_i32_26 = arith.constant 13421772 : i32
    %78 = vector.broadcast %c13421772_i32_26 : i32 to vector<8x16xi32>
    %79 = arith.cmpi slt, %77, %78 : vector<8x16xi32>
    %cst_27 = arith.constant 1.250000e+00 : f32
    %80 = vector.broadcast %cst_27 : f32 to vector<8x16xf32>
    %81 = arith.mulf %49, %80 : vector<8x16xf32>
    %cst_28 = arith.constant 0.000000e+00 : f32
    %82 = vector.broadcast %cst_28 : f32 to vector<8x16xf32>
    %83 = arith.select %79, %81, %82 : vector<8x16xi1>, vector<8x16xf32>
    %c0_29 = arith.constant 0 : index
    %c0_30 = arith.constant 0 : index
    %84 = vector.load %arg7[%c0_29, %c0_30] : memref<16x1xf32, #tpu.memory_space<vmem>>, vector<16x1xf32>
    %cst_31 = arith.constant dense<0.000000e+00> : vector<8x1xf32>
    %85 = tpu.matmul %83, %84, %cst_31 {dimension_numbers = #tpu.dot_dimension_numbers<[1], [0], [0], [1], [0, 0, 1, 1], [], []>} : vector<8x16xf32>, vector<16x1xf32>, vector<8x1xf32> -> vector<8x1xf32>
    %c0_32 = arith.constant 0 : index
    %c0_33 = arith.constant 0 : index
    %86 = vector.load %arg8[%c0_32, %c0_33] : memref<1x1xf32, #tpu.memory_space<vmem>>, vector<1x1xf32>
    %87 = vector.broadcast %86 : vector<1x1xf32> to vector<8x1xf32>
    %88 = arith.addf %85, %87 : vector<8x1xf32>
    %cst_34 = arith.constant 0.000000e+00 : f32
    %89 = vector.broadcast %cst_34 : f32 to vector<8x1xf32>
    %90 = arith.subf %89, %88 : vector<8x1xf32>
    %91 = math.exp %90 : vector<8x1xf32>
    %cst_35 = arith.constant 1.000000e+00 : f32
    %92 = vector.broadcast %cst_35 : f32 to vector<8x1xf32>
    %93 = arith.addf %92, %91 : vector<8x1xf32>
    %cst_36 = arith.constant 1.000000e+00 : f32
    %94 = vector.broadcast %cst_36 : f32 to vector<8x1xf32>
    %95 = arith.divf %94, %93 : vector<8x1xf32>
    %c0_37 = arith.constant 0 : index
    %c0_38 = arith.constant 0 : index
    %96 = vector.load %arg9[%c0_37, %c0_38] : memref<8x1xf32, #tpu.memory_space<vmem>>, vector<8x1xf32>
    tpu.vector_store %arg9[%c0_37, %c0_38], %95 {strides = array<i32>} : memref<8x1xf32, #tpu.memory_space<vmem>>, vector<8x1xf32>,
    return
  }
  func.func @transform_0(%arg0: i32) -> i32 {
    %c0_i32 = arith.constant 0 : i32
    %c0_i32_0 = arith.constant 0 : i32
    return %c0_i32 : i32
  }
  func.func @transform_1(%arg0: i32) -> (i32, i32) {
    %c0_i32 = arith.constant 0 : i32
    %c0_i32_0 = arith.constant 0 : i32
    return %arg0, %c0_i32 : i32, i32
  }
  func.func @transform_2(%arg0: i32) -> (i32, i32) {
    %c0_i32 = arith.constant 0 : i32
    %c0_i32_0 = arith.constant 0 : i32
    %c0_i32_1 = arith.constant 0 : i32
    return %c0_i32, %c0_i32_0 : i32, i32
  }
  func.func @transform_3(%arg0: i32) -> (i32, i32) {
    %c0_i32 = arith.constant 0 : i32
    %c0_i32_0 = arith.constant 0 : i32
    %c0_i32_1 = arith.constant 0 : i32
    return %c0_i32, %c0_i32_0 : i32, i32
  }
  func.func @transform_4(%arg0: i32) -> (i32, i32) {
    %c0_i32 = arith.constant 0 : i32
    %c0_i32_0 = arith.constant 0 : i32
    %c0_i32_1 = arith.constant 0 : i32
    return %c0_i32, %c0_i32_0 : i32, i32
  }
  func.func @transform_5(%arg0: i32) -> (i32, i32) {
    %c0_i32 = arith.constant 0 : i32
    %c0_i32_0 = arith.constant 0 : i32
    %c0_i32_1 = arith.constant 0 : i32
    return %c0_i32, %c0_i32_0 : i32, i32
  }
  func.func @transform_6(%arg0: i32) -> (i32, i32) {
    %c0_i32 = arith.constant 0 : i32
    %c0_i32_0 = arith.constant 0 : i32
    %c0_i32_1 = arith.constant 0 : i32
    return %c0_i32, %c0_i32_0 : i32, i32
  }
  func.func @transform_7(%arg0: i32) -> (i32, i32) {
    %c0_i32 = arith.constant 0 : i32
    %c0_i32_0 = arith.constant 0 : i32
    %c0_i32_1 = arith.constant 0 : i32
    return %c0_i32, %c0_i32_0 : i32, i32
  }
  func.func @transform_8(%arg0: i32) -> (i32, i32) {
    %c0_i32 = arith.constant 0 : i32
    %c0_i32_0 = arith.constant 0 : i32
    return %arg0, %c0_i32 : i32, i32
  }
}

</mosaic_0001>

<bundles_post_ra>
// kernel: tpu_custom_call.1
= control target key start
LH: loop header
LB: loop body
LE: loop exit
PB: predicated region body
PF: predicated region fallthrough
CT: control target
= control target key end

     0   :  { %v404_v0 = vmov 0.0|0.0   ;;  %vm49_vm0 = vcmask 1045504   ;;  %vm405_vm1 = vmmov 0   ;;  %v406_v6 = vmov 0.0   ;;  %s500_s2 = inlined_call_operand.vmem [shape: f32[30,16], index: 2, kind: input, shape index: {}]   ;;  %s501_s1 = inlined_call_operand.vmem [shape: f32[8,30], index: 1, kind: input, shape index: {}]   ;;  %s502_s4 = inlined_call_operand.vmem [shape: f32[16,16], index: 4, kind: input, shape index: {}]   ;;  %s503_s0 = inlined_call_operand.<no memory space> [shape: s32[1], index: 0, kind: input, shape index: {}]   ;;  %s504_s3 = inlined_call_operand.vmem [shape: f32[1,16], index: 3, kind: input, shape index: {}]   ;;  %s505_s6 = inlined_call_operand.vmem [shape: f32[16,1], index: 6, kind: input, shape index: {}]   ;;  %s506_s7 = inlined_call_operand.<no memory space> [shape: f32[1,1], index: 7, kind: input, shape index: {}]   ;;  %s507_s5 = inlined_call_operand.vmem [shape: f32[1,16], index: 5, kind: input, shape index: {}]   ;;  %s508_s8 = inlined_call_operand.vmem [shape: f32[8,1], index: 8, kind: output, shape index: {}]  }
   0x1   :  { %383 = vmatprep.subr.bf16.mxu0 %v404_v0  ;;  %v34_v1 = vld [vmem:[%s500_s2] sm:$0xff]  ;;  %v35_v2 = vld [vmem:[%s500_s2 + $0x8] sm:$0xff]  ;;  %v36_v3 = vld [vmem:[%s500_s2 + $0x10] sm:$0xff]  ;;  %390 = vmatprep.subr.bf16.mxu1 %v404_v0  ;;  %vm407_vm2 = vmmov 1   ;;  %vm45_vm4 = vcmask 244736   ;;  %v124_v12 = vlaneseq  ;;  %vm157_vm6 = vcmask 130048  }
   0x2   :  { %v384_v4 = vpack.c.bf16 %v35_v2, %v34_v1  ;;  %v37_v5 = vld [vmem:[%s500_s2 + $0x18] sm:$0x3f]  ;;  %366 = vmatprep.mubr.msk.f32.mxu0 %vm405_vm1, %v406_v6  ;;  %373 = vmatprep.mubr.msk.f32.mxu1 %vm405_vm1, %v406_v6  ;;  %vm388_vm3 = vmpackc.low %vm49_vm0, %vm407_vm2  ;;  %v33_v8 = vld [vmem:[%s501_s1] sm:$0xff]  ;;  %s133_s1 = smul.u32 2654435761, %s503_s0  ;;  %v14_v38 = vstv %s506_s7  ;;  %vm334_vm8 = vcmask 7168  }
   0x3   :  { %v387_v7 = vpack.c.bf16 %v37_v5, %v36_v3  ;;  %v148_v9 = vld [vmem:[%s502_s4] sm:$0xff]  ;;  %v149_v10 = vld [vmem:[%s502_s4 + $0x8] sm:$0xff]  ;;  %v125_v13 = vshrl.u32 %v124_v12, 7  ;;  %v127_v14 = vand.u32 127, %v124_v12  ;;  %15 = vst [vmem:[#allocation3] sm:$0x1] %v14_v38 }
   0x4   :  { %385 = vmatpush3.bf16.msra.mxu0 %v384_v4  ;;  %v391_v11 = vpack.c.bf16 %v149_v10, %v148_v9  ;;  %v134_v17 = vstv %s133_s1  ;;  %v340_v27 = vld [vmem:[%s504_s3] ss:$0 sm:$0xff]  ;;  %v247_v36 = vld [vmem:[%s505_s6 + $0x8] sm:$0xff] }
   0x5   :  { %386 = vmatprep.subr.bf16.mxu0 %v404_v0  ;;  %v131_v15 = vmul.u32 32, %v125_v13  ;;  %v246_v35 = vld [vmem:[%s505_s6] sm:$0xff] }
   0x6   :  { %392 = vmatpush3.bf16.msra.mxu1 %v391_v11  ;;  %v394_v37 = vpack.c.bf16 %v247_v36, %v246_v35  ;;  %v343_v49 = vld [vmem:[%s507_s5] ss:$0 sm:$0xff] }
   0x7   :  { %393 = vmatprep.subr.bf16.mxu1 %v404_v0  ;;  %v132_v16 = vadd.s32 %v131_v15, %v127_v14 }
   0x8   :  { %389 = vmatpush3.bf16.msk.msra.mxu0 %vm388_vm3, %v387_v7 }
   0x9   :  { %v135_v18 = vxor.u32 %v134_v17, %v132_v16  ;;  %v232_v39 = vadd.s32 16, %v132_v16 }
   0xa   :  { %v345_v57 = vld [vmem:[#allocation3] ss:$0 sm:$0xff] }
   0xb   :  { %367 = vmatmul.mubr.msk.f32.vlgmr.msra.gmra.mrb[0].mxu0 %vm45_vm4, %v33_v8  ;;  %v136_v19 = vshrl.u32 %v135_v18, 16  ;;  %v233_v40 = vxor.u32 %v232_v39, %v134_v17 }
   0xd   :  { %v137_v20 = vxor.u32 %v136_v19, %v135_v18  ;;  %v234_v41 = vshrl.u32 %v233_v40, 16 }
   0xf   :  { %v138_v21 = vmul.u32 2246822507, %v137_v20  ;;  %v235_v42 = vxor.u32 %v234_v41, %v233_v40 }
  0x11   :  { %v139_v22 = vshrl.u32 %v138_v21, 13  ;;  %v236_v43 = vmul.u32 2246822507, %v235_v42 }
  0x13   :  { %v140_v23 = vxor.u32 %v139_v22, %v138_v21  ;;  %v237_v44 = vshrl.u32 %v236_v43, 13 }
  0x15   :  { %v141_v24 = vmul.u32 3266489909, %v140_v23  ;;  %v238_v45 = vxor.u32 %v237_v44, %v236_v43 }
  0x17   :  { %v142_v25 = vshrl.u32 %v141_v24, 16  ;;  %v239_v46 = vmul.u32 3266489909, %v238_v45 }
  0x19   :  { %v143_v26 = vxor.u32 %v142_v25, %v141_v24  ;;  %v240_v47 = vshrl.u32 %v239_v46, 16 }
  0x1b   :  { %v144_v29 = vand.u32 16777215, %v143_v26  ;;  %v241_v48 = vxor.u32 %v240_v47, %v239_v46 }
  0x1d   :  { %vm145_vm5 = vcmp.lt.s32.totalorder %v144_v29, 13421772  ;;  %v242_v51 = vand.u32 16777215, %v241_v48 }
  0x1f   :  { %vm243_vm7 = vcmp.lt.s32.totalorder %v242_v51, 13421772 }
  0xde   :  { %v119_v28 = vpop.f32.mrb[0].mxu0 }
  0xdf   :  { %v120_v30 = vadd.f32 %v340_v27, %v119_v28  ;;  %v368_v31 = vpop.f32.mrb[1].mxu0 }
  0xe1   :  { %v123_v32 = vmax.f32 %v120_v30, 0.0 }
  0xe3   :  { %v146_v33 = vmul.f32 1.25, %v123_v32 }
  0xe5   :  { %v147_v34 = vsel %vm145_vm5, %v146_v33, 0.0 }
  0xe6   :  { %374 = vmatmul.mubr.msk.f32.vlgmr.msra.gmra.mrb[0].mxu1 %vm157_vm6, %v147_v34 }
  0xe7   :  { %380 = vmatprep.mubr.msk.f32.mxu1 %vm405_vm1, %v406_v6  ;;  %395 = vmatpush3.bf16.msra.mxu1 %v394_v37 }
 0x1b9   :  { %v227_v50 = vpop.f32.mrb[0].mxu1 }
 0x1ba   :  { %v228_v52 = vadd.f32 %v343_v49, %v227_v50  ;;  %v375_v53 = vpop.f32.mrb[1].mxu1 }
 0x1bc   :  { %v231_v54 = vmax.f32 %v228_v52, 0.0 }
 0x1be   :  { %v244_v55 = vmul.f32 1.25, %v231_v54 }
 0x1c0   :  { %v245_v56 = vsel %vm243_vm7, %v244_v55, 0.0 }
 0x1c1   :  { %381 = vmatmul.mubr.msk.f32.vlgmr.msra.gmra.mrb[2].mxu1 %vm157_vm6, %v245_v56 }
 0x294   :  { %v324_v58 = vpop.f32.mrb[2].mxu1 }
 0x295   :  { %v325_v59 = vadd.f32 %v345_v57, %v324_v58  ;;  %v382_v60 = vpop.f32.mrb[3].mxu1 }
 0x297   :  { %v328_v61 = vsub.f32 0.0, %v325_v59 }
 0x299   :  { %v329_v62 = vmul.f32 1.442695, %v328_v61 }
 0x29b   :  { %400 = vpow2.f32 %v329_v62 }
 0x2a5   :  { %v401_v63 = vpop.eup %400 }
 0x2a6   :  { %v331_v0 = vadd.f32 1.0, %v401_v63 }
 0x2a8   :  { %402 = vrcp.f32 %v331_v0 }
 0x2b2   :  { %v403_v1 = vpop.eup %402 }
 0x2b3   :  { %335 = vst.msk [vmem:[%s508_s8] sm:$0xff] %vm334_vm8, %v403_v1 }

</bundles_post_ra>
